<compile_context>
chip_gen: v7x
topology: tpu7x:2x2x1
jax: 0.10.0
libtpu: 0.0.40
codegen_flags: <defaults>
</compile_context>

<pallas_src>
import jax
import jax.numpy as jnp
from jax.experimental import pallas as pl
from jax.experimental.pallas import tpu as pltpu

INP_CHANNELS = 1
OUT_CHANNELS = 4
CHAN = OUT_CHANNELS // 2          # number of direction pairs (= 2)
VESSEL_SCALE = 16.0
SEG_CLASSES = 21                  # deeplabv3_resnet101 default num_classes

# seg channels the head reads: directions (0..3), scale logits (4,5), recon (20)
_USED_SEG_CHANNELS = (0, 1, 2, 3, 4, 5, SEG_CLASSES - INP_CHANNELS)
_N_USED = len(_USED_SEG_CHANNELS)     # 7
_REC_IDX = 2 * CHAN + CHAN            # index of the recon row in the table

# ~256K pixels/step = 1 MiB per f32 plane; (1 in + 5 out) planes x 2 buffers
# ~= 12 MiB VMEM.  Amortizes the ~0.35us/step fixed cost to <2% on v6e and is
# safely inside v7x's 32 MiB scoped / 64 MiB physical VMEM.
_TARGET_PIX_PER_STEP = 256 * 1024
_VMEM_LIMIT_BYTES = 32 << 20


# ----------------------------------------------------------------------------
# Host-side layout helpers
# ----------------------------------------------------------------------------
def _plane_layout(hw):
    """Pick lanes (multiple of 128) minimizing padding; return (rows, lanes, padded_hw)."""
    best = None
    for lanes in (1024, 512, 256, 128):
        padded = pl.cdiv(hw, lanes) * lanes
        if best is None or padded - hw < best[0]:
            best = (padded - hw, lanes, padded)
    _, lanes, padded = best
    return padded // lanes, lanes, padded


def _choose_row_tile(batch, rows, lanes):
    """Rows per grid step; ragged last block handled by pl.cdiv grid."""
    target_rows = max(1, _TARGET_PIX_PER_STEP // lanes)
    if rows <= target_rows:
        tr = rows                                  # whole plane in one step
    else:
        tr = max(8, (target_rows // 8) * 8)        # multiple of 8 (sublane)
    # v7x has two TensorCores sharing HBM: expose >= 2 parallel grid steps.
    if batch * pl.cdiv(rows, tr) < 2 and rows >= 16:
        tr = max(8, (pl.cdiv(rows, 2) // 8) * 8)
    return tr


# ----------------------------------------------------------------------------
# Fused head kernel.
#   coef_ref : (14,) f32 in SMEM (scalar-prefetched): [a(7) | c(7)] where the
#              folded per-channel affine is seg_k = a_k * x + c_k.
#   x_ref    : (TR, L) native-dtype dense pixel plane (one image tile)
#   ves_ref  : (4, TR, L) f32 vessel output planes
#   rec_ref  : (TR, L) f32 recon output plane
# Pure VPU/EUP work; no MXU, no cross-lane reductions.
# ----------------------------------------------------------------------------
def _fused_head_kernel(coef_ref, x_ref, ves_ref, rec_ref):
    x = x_ref[...].astype(jnp.float32)                      # cast in-kernel
    a = [coef_ref[i] for i in range(_N_USED)]               # hoisted SMEM reads
    c = [coef_ref[_N_USED + i] for i in range(_N_USED)]

    rec_ref[...] = a[_REC_IDX] * x + c[_REC_IDX]            # recon = seg[20]

    half_scale = 0.5 * VESSEL_SCALE
    for i in range(CHAN):                                   # tiny, unrolled
        d0 = a[2 * i] * x + c[2 * i]                        # seg[2i]
        d1 = a[2 * i + 1] * x + c[2 * i + 1]                # seg[2i+1]
        z = a[2 * CHAN + i] * x + c[2 * CHAN + i]           # seg[2*chan + i]
        # scale * sigmoid(z) in tanh form: one EUP op, no VALU divide.
        s = half_scale * jnp.tanh(0.5 * z) + half_scale
        g = s * jax.lax.rsqrt(1e-10 + d0 * d0 + d1 * d1)    # scale / norm (EUP)
        ves_ref[2 * i] = d0 * g
        ves_ref[2 * i + 1] = d1 * g


def fused_head(coef, x_planes, *, row_tile):
    """x_planes: (B, rows, lanes) -> vessel (B, 4, rows, lanes), recon (B, 1, rows, lanes)."""
    b, rows, lanes = x_planes.shape
    grid = (b, pl.cdiv(rows, row_tile))                     # ragged last block OK
    return pl.pallas_call(
        _fused_head_kernel,
        out_shape=(
            jax.ShapeDtypeStruct((b, OUT_CHANNELS, rows, lanes), jnp.float32),
            jax.ShapeDtypeStruct((b, INP_CHANNELS, rows, lanes), jnp.float32),
        ),
        grid_spec=pltpu.PrefetchScalarGridSpec(
            num_scalar_prefetch=1,                          # coef -> SMEM, once
            grid=grid,
            in_specs=[
                pl.BlockSpec((None, row_tile, lanes),
                             lambda bb, rr, coef_r: (bb, rr, 0)),
            ],
            out_specs=[
                pl.BlockSpec((None, OUT_CHANNELS, row_tile, lanes),
                             lambda bb, rr, coef_r: (bb, 0, rr, 0)),
                pl.BlockSpec((None, None, row_tile, lanes),
                             lambda bb, rr, coef_r: (bb, 0, rr, 0)),
            ],
        ),
        compiler_params=pltpu.CompilerParams(
            dimension_semantics=("parallel", "parallel"),
            vmem_limit_bytes=_VMEM_LIMIT_BYTES),
    )(coef, x_planes)


# ----------------------------------------------------------------------------
# Module wrapper
# ----------------------------------------------------------------------------
class DeepLabV3Pallas:
    def __init__(self, key):
        k1, k2, k3, k4 = jax.random.split(key, 4)
        # initconv: Conv2d(inp_channels, 3, kernel_size=1)
        self.w_init = (0.5 * jax.random.normal(k1, (3, INP_CHANNELS))
                       ).astype(jnp.float32)
        self.b_init = (0.1 * jax.random.normal(k2, (3,))).astype(jnp.float32)
        # TODO(synk): the torchvision deeplabv3_resnet101 backbone (ResNet-101
        # + ASPP + bilinear upsample to input size) is not replicated here; it
        # is stood in by a 1x1 projection 3 -> 21 segmentation channels so the
        # head semantics can be exercised.
        self.w_seg = (0.5 * jax.random.normal(k3, (SEG_CLASSES, 3))
                      ).astype(jnp.float32)
        self.b_seg = (0.1 * jax.random.normal(k4, (SEG_CLASSES,))
                      ).astype(jnp.float32)

        # Fold initconv + 1x1 seg projection into a per-channel affine
        # (valid because inp_channels == 1):  seg = a * x + c.
        assert INP_CHANNELS == 1
        a_full = (self.w_seg @ self.w_init)[:, 0]                 # (21,)
        c_full = self.w_seg @ self.b_init + self.b_seg            # (21,)
        used = jnp.asarray(_USED_SEG_CHANNELS, dtype=jnp.int32)
        # Single (14,) SMEM table: [a_used | c_used]
        self.coef = jnp.concatenate(
            [a_full[used], c_full[used]]).astype(jnp.float32)

    def __call__(self, batch):
        x = batch['image']                        # NCHW, like the PyTorch module
        b, cin, h, w = x.shape
        assert cin == INP_CHANNELS
        hw = h * w
        rows, lanes, padded_hw = _plane_layout(hw)
        tr = _choose_row_tile(b, rows, lanes)

        # NCHW (C=1) -> dense per-image pixel planes (contiguous => free
        # reshape).  Pad to a lane-dense plane only if H*W % 128 != 0 so every
        # output store is an unmasked full-lane vst.  Keep native dtype; the
        # kernel casts after the (narrower) HBM read.
        x_flat = x.reshape(b, hw)
        if padded_hw != hw:
            x_flat = jnp.pad(x_flat, ((0, 0), (0, padded_hw - hw)))
        x_planes = x_flat.reshape(b, rows, lanes)

        vessel_pl, recon_pl = fused_head(self.coef, x_planes, row_tile=tr)

        # Outputs are in NCHW element order; reshapes are metadata-only when
        # no padding was needed, and a cheap slice otherwise.
        vessel = vessel_pl.reshape(b, OUT_CHANNELS, padded_hw)
        recon = recon_pl.reshape(b, INP_CHANNELS, padded_hw)
        if padded_hw != hw:
            vessel = vessel[:, :, :hw]
            recon = recon[:, :, :hw]
        vessel = vessel.reshape(b, OUT_CHANNELS, h, w)
        recon = recon.reshape(b, INP_CHANNELS, h, w)
        return {'recon': recon, 'vessel': vessel}


# ----------------------------------------------------------------------------
# Pure-JAX reference (unfused, mirrors the original PyTorch ordering)
# ----------------------------------------------------------------------------
def reference(x, w_init, b_init, w_seg, b_seg):
    b, cin, h, w = x.shape
    xf = x.reshape(b, cin, h * w).astype(jnp.float32)
    feat = jnp.einsum('oc,bcp->bop', w_init, xf) + b_init[None, :, None]
    seg = jnp.einsum('oc,bcp->bop', w_seg, feat) + b_seg[None, :, None]
    out = seg[:, :OUT_CHANNELS * 3 // 2]
    recon = seg[:, -INP_CHANNELS:]
    ves = []
    for i in range(CHAN):
        d = out[:, 2 * i:2 * i + 2]
        s = out[:, 2 * CHAN + i:2 * CHAN + i + 1]
        s = VESSEL_SCALE * jax.nn.sigmoid(s)
        norm = jnp.sqrt(1e-10 + jnp.sum(d * d, axis=1, keepdims=True))
        ves.append(d / norm * s)
    vessel = jnp.concatenate(ves, axis=1)
    return (recon.reshape(b, INP_CHANNELS, h, w),
            vessel.reshape(b, OUT_CHANNELS, h, w))


def _check(model, x):
    out = model({'image': x})
    recon = jax.block_until_ready(out['recon'])
    vessel = jax.block_until_ready(out['vessel'])
    b, _, h, w = x.shape
    assert recon.shape == (b, INP_CHANNELS, h, w)
    assert vessel.shape == (b, OUT_CHANNELS, h, w)
    ref_recon, ref_vessel = reference(
        x, model.w_init, model.b_init, model.w_seg, model.b_seg)
    assert jnp.allclose(recon, ref_recon, atol=1e-4, rtol=1e-4)
    assert jnp.allclose(vessel, ref_vessel, atol=1e-4, rtol=1e-4)


if __name__ == "__main__":
    key = jax.random.PRNGKey(0)
    k_model, k_data1, k_data2 = jax.random.split(key, 3)

    model = DeepLabV3Pallas(k_model)

    # Lane-aligned case (H*W % 128 == 0): no padding, metadata-only reshapes.
    B, H, W = 2, 16, 16
    x1 = jax.random.normal(k_data1, (B, INP_CHANNELS, H, W), dtype=jnp.float32)
    _check(model, x1)

    # Awkward case (H*W % 128 != 0): exercises the host-side pad + slice path.
    H2, W2 = 24, 24
    x2 = jax.random.normal(k_data2, (B, INP_CHANNELS, H2, W2), dtype=jnp.float32)
    _check(model, x2)

    print("KERNEL_OK")
</pallas_src>

<mosaic_0001>
module attributes {stable_mosaic.version = 11 : i64} {
  func.func @_fused_head_kernel(%arg0: i32, %arg1: i32, %arg2: memref<14xf32, #tpu.memory_space<smem>>, %arg3: memref<1x1x256xf32, #tpu.memory_space<vmem>>, %arg4: memref<1x4x1x256xf32, #tpu.memory_space<vmem>>, %arg5: memref<1x1x1x256xf32, #tpu.memory_space<vmem>>) attributes {dimension_semantics = [#tpu.dimension_semantics<parallel>, #tpu.dimension_semantics<parallel>], iteration_bounds = array<i64: 2, 1>, scalar_prefetch = 1 : i64, scratch_operands = 0 : i64, tpu.core_type = #tpu.core_type<tc>, window_params = [{transform_indices = @transform_0, window_bounds = array<i64: 1, 1, 256>}, {transform_indices = @transform_1, window_bounds = array<i64: 1, 4, 1, 256>}, {transform_indices = @transform_2, window_bounds = array<i64: 1, 1, 1, 256>}]} {
    %c0 = arith.constant 0 : index
    %c0_0 = arith.constant 0 : index
    %c0_1 = arith.constant 0 : index
    %0 = vector.load %arg3[%c0, %c0_0, %c0_1] : memref<1x1x256xf32, #tpu.memory_space<vmem>>, vector<1x1x256xf32>
    %1 = vector.shape_cast %0 : vector<1x1x256xf32> to vector<1x256xf32>
    %c0_2 = arith.constant 0 : index
    %2 = memref.load %arg2[%c0_2] : memref<14xf32, #tpu.memory_space<smem>>
    %c1 = arith.constant 1 : index
    %3 = memref.load %arg2[%c1] : memref<14xf32, #tpu.memory_space<smem>>
    %c2 = arith.constant 2 : index
    %4 = memref.load %arg2[%c2] : memref<14xf32, #tpu.memory_space<smem>>
    %c3 = arith.constant 3 : index
    %5 = memref.load %arg2[%c3] : memref<14xf32, #tpu.memory_space<smem>>
    %c4 = arith.constant 4 : index
    %6 = memref.load %arg2[%c4] : memref<14xf32, #tpu.memory_space<smem>>
    %c5 = arith.constant 5 : index
    %7 = memref.load %arg2[%c5] : memref<14xf32, #tpu.memory_space<smem>>
    %c6 = arith.constant 6 : index
    %8 = memref.load %arg2[%c6] : memref<14xf32, #tpu.memory_space<smem>>
    %c7 = arith.constant 7 : index
    %9 = memref.load %arg2[%c7] : memref<14xf32, #tpu.memory_space<smem>>
    %c8 = arith.constant 8 : index
    %10 = memref.load %arg2[%c8] : memref<14xf32, #tpu.memory_space<smem>>
    %c9 = arith.constant 9 : index
    %11 = memref.load %arg2[%c9] : memref<14xf32, #tpu.memory_space<smem>>
    %c10 = arith.constant 10 : index
    %12 = memref.load %arg2[%c10] : memref<14xf32, #tpu.memory_space<smem>>
    %c11 = arith.constant 11 : index
    %13 = memref.load %arg2[%c11] : memref<14xf32, #tpu.memory_space<smem>>
    %c12 = arith.constant 12 : index
    %14 = memref.load %arg2[%c12] : memref<14xf32, #tpu.memory_space<smem>>
    %c13 = arith.constant 13 : index
    %15 = memref.load %arg2[%c13] : memref<14xf32, #tpu.memory_space<smem>>
    %16 = vector.broadcast %8 : f32 to vector<1x256xf32>
    %17 = arith.mulf %16, %1 : vector<1x256xf32>
    %18 = vector.broadcast %15 : f32 to vector<1x256xf32>
    %19 = arith.addf %17, %18 : vector<1x256xf32>
    %c0_3 = arith.constant 0 : index
    %c0_4 = arith.constant 0 : index
    %c0_5 = arith.constant 0 : index
    %c0_6 = arith.constant 0 : index
    %20 = vector.load %arg5[%c0_3, %c0_4, %c0_5, %c0_6] : memref<1x1x1x256xf32, #tpu.memory_space<vmem>>, vector<1x1x1x256xf32>
    %21 = vector.shape_cast %20 : vector<1x1x1x256xf32> to vector<1x256xf32>
    %22 = vector.shape_cast %19 : vector<1x256xf32> to vector<1x1x1x256xf32>
    tpu.vector_store %arg5[%c0_3, %c0_4, %c0_5, %c0_6], %22 {strides = array<i32>} : memref<1x1x1x256xf32, #tpu.memory_space<vmem>>, vector<1x1x1x256xf32>,
    %23 = vector.broadcast %2 : f32 to vector<1x256xf32>
    %24 = arith.mulf %23, %1 : vector<1x256xf32>
    %25 = vector.broadcast %9 : f32 to vector<1x256xf32>
    %26 = arith.addf %24, %25 : vector<1x256xf32>
    %27 = vector.broadcast %3 : f32 to vector<1x256xf32>
    %28 = arith.mulf %27, %1 : vector<1x256xf32>
    %29 = vector.broadcast %10 : f32 to vector<1x256xf32>
    %30 = arith.addf %28, %29 : vector<1x256xf32>
    %31 = vector.broadcast %6 : f32 to vector<1x256xf32>
    %32 = arith.mulf %31, %1 : vector<1x256xf32>
    %33 = vector.broadcast %13 : f32 to vector<1x256xf32>
    %34 = arith.addf %32, %33 : vector<1x256xf32>
    %cst = arith.constant 5.000000e-01 : f32
    %35 = vector.broadcast %cst : f32 to vector<1x256xf32>
    %36 = arith.mulf %35, %34 : vector<1x256xf32>
    %37 = math.tanh %36 : vector<1x256xf32>
    %cst_7 = arith.constant 8.000000e+00 : f32
    %38 = vector.broadcast %cst_7 : f32 to vector<1x256xf32>
    %39 = arith.mulf %38, %37 : vector<1x256xf32>
    %cst_8 = arith.constant 8.000000e+00 : f32
    %40 = vector.broadcast %cst_8 : f32 to vector<1x256xf32>
    %41 = arith.addf %39, %40 : vector<1x256xf32>
    %42 = arith.mulf %26, %26 : vector<1x256xf32>
    %cst_9 = arith.constant 1.000000e-10 : f32
    %43 = vector.broadcast %cst_9 : f32 to vector<1x256xf32>
    %44 = arith.addf %43, %42 : vector<1x256xf32>
    %45 = arith.mulf %30, %30 : vector<1x256xf32>
    %46 = arith.addf %44, %45 : vector<1x256xf32>
    %47 = math.rsqrt %46 : vector<1x256xf32>
    %48 = arith.mulf %41, %47 : vector<1x256xf32>
    %49 = arith.mulf %26, %48 : vector<1x256xf32>
    %c0_10 = arith.constant 0 : index
    %c0_11 = arith.constant 0 : index
    %c0_12 = arith.constant 0 : index
    %c0_13 = arith.constant 0 : index
    %50 = vector.load %arg4[%c0_10, %c0_11, %c0_12, %c0_13] : memref<1x4x1x256xf32, #tpu.memory_space<vmem>>, vector<1x1x1x256xf32>
    %51 = vector.shape_cast %50 : vector<1x1x1x256xf32> to vector<1x256xf32>
    %52 = vector.shape_cast %49 : vector<1x256xf32> to vector<1x1x1x256xf32>
    tpu.vector_store %arg4[%c0_10, %c0_11, %c0_12, %c0_13], %52 {strides = array<i32>} : memref<1x4x1x256xf32, #tpu.memory_space<vmem>>, vector<1x1x1x256xf32>,
    %53 = arith.mulf %30, %48 : vector<1x256xf32>
    %c0_14 = arith.constant 0 : index
    %c1_15 = arith.constant 1 : index
    %c0_16 = arith.constant 0 : index
    %c0_17 = arith.constant 0 : index
    %54 = vector.load %arg4[%c0_14, %c1_15, %c0_16, %c0_17] : memref<1x4x1x256xf32, #tpu.memory_space<vmem>>, vector<1x1x1x256xf32>
    %55 = vector.shape_cast %54 : vector<1x1x1x256xf32> to vector<1x256xf32>
    %56 = vector.shape_cast %53 : vector<1x256xf32> to vector<1x1x1x256xf32>
    tpu.vector_store %arg4[%c0_14, %c1_15, %c0_16, %c0_17], %56 {strides = array<i32>} : memref<1x4x1x256xf32, #tpu.memory_space<vmem>>, vector<1x1x1x256xf32>,
    %57 = vector.broadcast %4 : f32 to vector<1x256xf32>
    %58 = arith.mulf %57, %1 : vector<1x256xf32>
    %59 = vector.broadcast %11 : f32 to vector<1x256xf32>
    %60 = arith.addf %58, %59 : vector<1x256xf32>
    %61 = vector.broadcast %5 : f32 to vector<1x256xf32>
    %62 = arith.mulf %61, %1 : vector<1x256xf32>
    %63 = vector.broadcast %12 : f32 to vector<1x256xf32>
    %64 = arith.addf %62, %63 : vector<1x256xf32>
    %65 = vector.broadcast %7 : f32 to vector<1x256xf32>
    %66 = arith.mulf %65, %1 : vector<1x256xf32>
    %67 = vector.broadcast %14 : f32 to vector<1x256xf32>
    %68 = arith.addf %66, %67 : vector<1x256xf32>
    %cst_18 = arith.constant 5.000000e-01 : f32
    %69 = vector.broadcast %cst_18 : f32 to vector<1x256xf32>
    %70 = arith.mulf %69, %68 : vector<1x256xf32>
    %71 = math.tanh %70 : vector<1x256xf32>
    %cst_19 = arith.constant 8.000000e+00 : f32
    %72 = vector.broadcast %cst_19 : f32 to vector<1x256xf32>
    %73 = arith.mulf %72, %71 : vector<1x256xf32>
    %cst_20 = arith.constant 8.000000e+00 : f32
    %74 = vector.broadcast %cst_20 : f32 to vector<1x256xf32>
    %75 = arith.addf %73, %74 : vector<1x256xf32>
    %76 = arith.mulf %60, %60 : vector<1x256xf32>
    %cst_21 = arith.constant 1.000000e-10 : f32
    %77 = vector.broadcast %cst_21 : f32 to vector<1x256xf32>
    %78 = arith.addf %77, %76 : vector<1x256xf32>
    %79 = arith.mulf %64, %64 : vector<1x256xf32>
    %80 = arith.addf %78, %79 : vector<1x256xf32>
    %81 = math.rsqrt %80 : vector<1x256xf32>
    %82 = arith.mulf %75, %81 : vector<1x256xf32>
    %83 = arith.mulf %60, %82 : vector<1x256xf32>
    %c0_22 = arith.constant 0 : index
    %c2_23 = arith.constant 2 : index
    %c0_24 = arith.constant 0 : index
    %c0_25 = arith.constant 0 : index
    %84 = vector.load %arg4[%c0_22, %c2_23, %c0_24, %c0_25] : memref<1x4x1x256xf32, #tpu.memory_space<vmem>>, vector<1x1x1x256xf32>
    %85 = vector.shape_cast %84 : vector<1x1x1x256xf32> to vector<1x256xf32>
    %86 = vector.shape_cast %83 : vector<1x256xf32> to vector<1x1x1x256xf32>
    tpu.vector_store %arg4[%c0_22, %c2_23, %c0_24, %c0_25], %86 {strides = array<i32>} : memref<1x4x1x256xf32, #tpu.memory_space<vmem>>, vector<1x1x1x256xf32>,
    %87 = arith.mulf %64, %82 : vector<1x256xf32>
    %c0_26 = arith.constant 0 : index
    %c3_27 = arith.constant 3 : index
    %c0_28 = arith.constant 0 : index
    %c0_29 = arith.constant 0 : index
    %88 = vector.load %arg4[%c0_26, %c3_27, %c0_28, %c0_29] : memref<1x4x1x256xf32, #tpu.memory_space<vmem>>, vector<1x1x1x256xf32>
    %89 = vector.shape_cast %88 : vector<1x1x1x256xf32> to vector<1x256xf32>
    %90 = vector.shape_cast %87 : vector<1x256xf32> to vector<1x1x1x256xf32>
    tpu.vector_store %arg4[%c0_26, %c3_27, %c0_28, %c0_29], %90 {strides = array<i32>} : memref<1x4x1x256xf32, #tpu.memory_space<vmem>>, vector<1x1x1x256xf32>,
    return
  }
  func.func @transform_0(%arg0: i32, %arg1: i32, %arg2: memref<14xf32, #tpu.memory_space<smem>>) -> (i32, i32, i32) {
    %c0_i32 = arith.constant 0 : i32
    %c0_i32_0 = arith.constant 0 : i32
    return %arg0, %arg1, %c0_i32 : i32, i32, i32
  }
  func.func @transform_1(%arg0: i32, %arg1: i32, %arg2: memref<14xf32, #tpu.memory_space<smem>>) -> (i32, i32, i32, i32) {
    %c0_i32 = arith.constant 0 : i32
    %c0_i32_0 = arith.constant 0 : i32
    %c0_i32_1 = arith.constant 0 : i32
    return %arg0, %c0_i32, %arg1, %c0_i32_0 : i32, i32, i32, i32
  }
  func.func @transform_2(%arg0: i32, %arg1: i32, %arg2: memref<14xf32, #tpu.memory_space<smem>>) -> (i32, i32, i32, i32) {
    %c0_i32 = arith.constant 0 : i32
    %c0_i32_0 = arith.constant 0 : i32
    %c0_i32_1 = arith.constant 0 : i32
    return %arg0, %c0_i32, %arg1, %c0_i32_0 : i32, i32, i32, i32
  }
}

</mosaic_0001>

<bundles_post_ra>
// kernel: tpu_custom_call.1
= control target key start
LH: loop header
LB: loop body
LE: loop exit
PB: predicated region body
PF: predicated region fallthrough
CT: control target
= control target key end

     0   :  { %s999_s0 = inlined_call_operand.hbm [shape: f32[14], index: 0, kind: input, shape index: {}]   ;;  %s1000_s1 = inlined_call_operand.hbm [shape: f32[2,1,256], index: 1, kind: input, shape index: {}]   ;;  %s1001_s2 = inlined_call_operand.hbm [shape: f32[2,4,1,256], index: 2, kind: output, shape index: {0}]   ;;  %s1002_s3 = inlined_call_operand.hbm [shape: f32[2,1,1,256], index: 3, kind: output, shape index: {1}]  }
   0x1   :  { %s550_s14 = scalar_lea.hbm %s999_s0, 16 }
   0x2   :  { %p551_p0 = scmp.ne.s32.totalorder %s999_s0, %s550_s14  ;;  %p554_p1 = scmp.lt.u32.totalorder %s550_s14, %s999_s0 }
   0x4   :  { %p556_p2 = pnand %p554_p1, %p551_p0 }
   0x6   :  { %559 = shalt.err (!%p556_p2)  }
   0x7   :  { %s708_s19 = smov [#allocation3]  }
   0x8   :  { %10 = dma.hbm_to_smem %s999_s0, 16, %s708_s19, [#allocation2] }
   0x9   :  { %670 = dma.done.wait [#allocation2], 16 }
   0xa   :  { %671 = vsyncadd [#allocation2], 4294967280 }
   0xb   :  { %12 = sfence }
   0xc   :  { %13 = vsyncpa [#allocation5], 0 }
   0xd   :  { %15 = vsyncpa [#allocation5 + $0x1], 0 }
   0xe   :  { %16 = vsyncpa [#allocation6], 0 }
   0xf   :  { %18 = vsyncpa [#allocation6 + $0x1], 0 }
  0x10   :  { %19 = vsyncpa [#allocation9], 0 }
  0x11   :  { %21 = vsyncpa [#allocation9 + $0x1], 0  ;;  %s746_s22 = smov 0   ;;  %s748_s23 = smov 0  }
  0x12   :  { %s750_s24 = smov 0   ;;  %s752_s25 = smov 0  }
  0x13   :  { %s754_s26 = smov 0   ;;  %s756_s0 = smov 0  }
  0x14 LB: > { %s434_s27 = sadd.s32 4294967295, %s706_s0   ;;  %s435_s28 = sadd.s32 4294967294, %s706_s0   ;;  %s706_s0 = sphi %s756_s0, %s27_s0   ;;  %s702_s26 = sphi %s754_s26, %s1020_s26   ;;  %s698_s25 = sphi %s752_s25, %s1019_s25   ;;  %s694_s24 = sphi %s750_s24, %s1018_s24   ;;  %s690_s23 = sphi %s748_s23, %s1017_s23   ;;  %s686_s22 = sphi %s746_s22, %s1016_s22  }
  0x15   : > { %s39_s29 = sadd.s32 1, %s702_s26  ;;  %s48_s30 = sadd.s32 1, %s694_s24 }
  0x16   : > { %p41_p3 = scmp.ge.s32.totalorder %s39_s29, 2  ;;  %p55_p4 = scmp.ne.s32.totalorder %s694_s24, %s690_s23 }
  0x17   : > { %p56_p5 = scmp.eq.s32.totalorder %s706_s0, 0  ;;  %p61_p6 = scmp.ne.s32.totalorder %s690_s23, %s686_s22 }
  0x18   : > { %s1022_s29 = smov (%p41_p3, %s39_s29), 0  ;;  %p62_p8 = scmp.eq.s32.totalorder %s434_s27, 0 }
  0x19   : > { %p787_p7 = por %p56_p5, %p55_p4  ;;  %s43_s5 = ssub.s32 %s702_s26, %s1022_s29 }
  0x1a   : > { %p87_p9 = scmp.eq.s32.totalorder %s434_s27, 1  ;;  %p46_p10 = scmp.eq.s32.totalorder %s43_s5, 0 }
  0x1b   : > { %p793_p11 = por %p62_p8, %p61_p6  ;;  %p93_p13 = scmp.eq.s32.totalorder %s435_s28, 1 }
  0x1c   : > { %p797_p12 = por %p87_p9, %p55_p4  ;;  %p489_p2 = scmp.lt.s32.totalorder %s706_s0, 2 }
  0x1d   : > { %s802_s8 = scalar_select %p46_p10, %s694_s24, %s48_s30  }
  0x1e   : > { %s1006_s7 = scalar_select %p797_p12, 1, 0 }
  0x1f   : > { %p804_p0 = por %p93_p13, %p61_p6  ;;  %s141_s10 = sand.u32 1, %s694_s24  }
  0x20   : > { %s438_s11 = sshll.u32 %s141_s10, 1  ;;  %s469_s12 = sshll.u32 %s702_s26, 5 }
  0x21   : > { %s1007_s9 = scalar_select %p804_p0, 1, 0 }
  0x22   : > { %s815_s15 = scalar_lea.hbm %s1000_s1, %s469_s12  ;;  %s145_s16 = scalar_lea.vmem [#allocation4], %s438_s11 }
  0x23   : > { %s155_s17 = sshll.u32 %s145_s16, 4  ;;  %p821_p3 = pnand %p489_p2, %p787_p7  ;;  %s817_s17 = int_to_ptr.vmem [resolvable:$true] %s155_s17 }
  0x24   : > { %s142_s19 = scalar_lea.sflag [#allocation5], %s141_s10  ;;  %s560_s20 = scalar_lea.hbm %s815_s15, 32 }
  0x25   : > { %p561_p6 = scmp.ne.s32.totalorder %s815_s15, %s560_s20  ;;  %p562_p8 = pneg %p821_p3 }
  0x26   : > { %s565_s28 = scalar_lea.hbm %s1000_s1, 64  ;;  %p566_p7 = scmp.lt.u32.totalorder %s815_s15, %s1000_s1 }
  0x27   : > { %p563_p9 = pnand %p562_p8, %p561_p6  ;;  %p567_p13 = scmp.lt.u32.totalorder %s565_s28, %s560_s20 }
  0x28   : > { %p569_p1 = scmp.lt.u32.totalorder %s560_s20, %s815_s15 }
  0x29   : > { %p564_p10 = pneg %p563_p9  ;;  %p568_p2 = por %p567_p13, %p566_p7 }
  0x2b   : > { %p570_p4 = por %p569_p1, %p568_p2 }
  0x2d   : > { %p571_p5 = pnand %p570_p4, %p564_p10 }
  0x2f   : > { %574 = shalt.err (!%p571_p5)
}
  0x30   : > { %s575_s5 = scalar_lea.vmem %s817_s17, 32  ;;  %s709_s10 = smov [#allocation4]  }
  0x31   : > { %p576_p6 = scmp.ne.s32.totalorder %s817_s17, %s575_s5  ;;  %s580_s11 = sshll.u32 %s709_s10, 4  ;;  %s581_s11 = int_to_ptr.vmem [resolvable:$false] %s580_s11 }
  0x32   : > { %s582_s12 = scalar_lea.vmem %s581_s11, 64  ;;  %p583_p12 = scmp.lt.s32.totalorder %s817_s17, %s581_s11 }
  0x33   : > { %p578_p9 = pnand %p576_p6, %p562_p8  ;;  %p584_p7 = scmp.lt.s32.totalorder %s582_s12, %s575_s5 }
  0x35   : > { %p579_p0 = pneg %p578_p9  ;;  %p585_p13 = por %p584_p7, %p583_p12 }
  0x37   : > { %p586_p1 = pnand %p585_p13, %p579_p0 }
  0x39   : > { %589 = shalt.err (!%p586_p1)
}
  0x3a   : > { %481 = dma.hbm_to_vmem [thread:$0]  (!%p821_p3), %s815_s15, 32, %s817_s17, %s142_s19  }
  0x3b   : > { %p1009_p4 = scmp.lt.s32.totalorder %s706_s0, 3  ;;  %p1010_p5 = scmp.ge.s32.totalorder %s706_s0, 1 }
  0x3d   : > { %p161_p8 = pnand %p1010_p5, %p1009_p4 }
  0x3e   : > { %s857_s13 = sand.u32 (!%p161_p8), 1, %s690_s23  }
  0x3f   : > { %164 = sbr.rel (%p161_p8) target bundleno = 143 (0x8f), region = 24  ;;  %s442_s14 = sshll.u32 (!%p161_p8), %s857_s13, 1 }
  0x40   : > { %s167_s16 = scalar_lea.sflag (!%p161_p8), [#allocation5], %s857_s13  ;;  %s170_s20 = scalar_lea.vmem (!%p161_p8), [#allocation4], %s442_s14 }
  0x46   : > { %673 = dma.done.wait (%p793_p11), %s167_s16, 32  }
  0x47   : > { %675 = vsyncadd (%p793_p11), %s167_s16, 4294967264  ;;  %s450_s18 = sld [smem:[#allocation3 + $0x6]]  ;;  %s457_s15 = sld [smem:[#allocation3 + $0xd]]  ;;  %v215_v0 = vlaneseq  ;;  %v865_v1 = vld [vmem:[%s170_s20] sm:$0x3] }
  0x48   : > { %s197_s17 = sld [smem:[#allocation3]]  ;;  %s445_s19 = sld [smem:[#allocation3 + $0x1]] }
  0x49   : > { %s448_s21 = sld [smem:[#allocation3 + $0x4]]  ;;  %s451_s27 = sld [smem:[#allocation3 + $0x7]]  ;;  %vm872_vm0 = vcmp.lt.s32.totalorder %v215_v0, 256 }
  0x4a   : > { %s452_s28 = sld [smem:[#allocation3 + $0x8]]  ;;  %s455_s30 = sld [smem:[#allocation3 + $0xb]] }
  0x4b   : > { %s195_s4 = scalar_lea.vmem [#allocation8], %s442_s14  ;;  %s446_s10 = sld [smem:[#allocation3 + $0x2]] }
  0x4c   : > { %s315_s5 = sshll.u32 %s195_s4, 4  ;;  %s868_s6 = sld [smem:[#allocation3 + $0x3]]  ;;  %s887_s5 = int_to_ptr.vmem [resolvable:$true] %s315_s5 }
  0x4d   : > { %v211_v2 = vstv %s450_s18  ;;  %v213_v3 = vstv %s457_s15  ;;  %s870_s11 = sld [smem:[#allocation3 + $0x5]]  ;;  %s876_s12 = sld [smem:[#allocation3 + $0x9]] }
  0x4e   : > { %v212_v4 = vmul.f32 %v211_v2, %v865_v1  ;;  %v220_v6 = vstv %s197_s17  ;;  %s878_s16 = sld [smem:[#allocation3 + $0xa]]  ;;  %v224_v9 = vstv %s445_s19  ;;  %s881_s14 = sld [smem:[#allocation3 + $0xc]] }
  0x4f   : > { %v221_v8 = vmul.f32 %v220_v6, %v865_v1  ;;  %v228_v10 = vstv %s448_s21  ;;  %v222_v11 = vstv %s451_s27  ;;  %v225_v12 = vmul.f32 %v224_v9, %v865_v1  ;;  %s471_s20 = sshll.u32 %s698_s25, 5  ;;  %s281_s19 = scalar_lea.sflag [#allocation9], %s857_s13 }
  0x50   : > { %v214_v7 = vadd.f32 %v213_v3, %v212_v4  ;;  %v226_v13 = vstv %s452_s28  ;;  %v229_v14 = vmul.f32 %v228_v10, %v865_v1  ;;  %v230_v16 = vstv %s455_s30  ;;  %s902_s17 = scalar_lea.hbm %s1002_s3, %s471_s20  ;;  %s590_s21 = scalar_lea.vmem %s887_s5, 32 }
  0x51   : > { %v889_v15 = vadd.f32 %v222_v11, %v221_v8  ;;  %v891_v17 = vadd.f32 %v226_v13, %v225_v12  ;;  %v247_v19 = vstv %s446_s10  ;;  %p591_p11 = scmp.ne.s32.totalorder %s887_s5, %s590_s21  ;;  %p1013_p12 = scmp.ne.s32.totalorder %s1006_s7, 0 }
  0x52   : > { %219 = vst.msk [vmem:[%s195_s4] sm:$0x3] %vm872_vm0, %v214_v7  ;;  %v231_v18 = vadd.f32 %v230_v16, %v229_v14  ;;  %v248_v21 = vmul.f32 %v247_v19, %v865_v1  ;;  %v251_v22 = vstv %s868_s6  ;;  %s710_s27 = smov [#allocation8]  }
  0x53   : > { %v236_v20 = vmul.f32 %v889_v15, %v889_v15  ;;  %v255_v23 = vstv %s870_s11  ;;  %v238_v25 = vmul.f32 %v891_v17, %v891_v17  ;;  %v249_v26 = vstv %s876_s12  ;;  %p592_p0 = pnand %p591_p11, %p1013_p12  ;;  %s594_s28 = sshll.u32 %s710_s27, 4  ;;  %s595_s28 = int_to_ptr.vmem [resolvable:$false] %s594_s28 }
  0x54   : > { %v232_v24 = vmul.f32 0.5, %v231_v18  ;;  %v252_v27 = vmul.f32 %v251_v22, %v865_v1  ;;  %s596_s30 = scalar_lea.vmem %s595_s28, 64  ;;  %p597_p10 = scmp.lt.s32.totalorder %s887_s5, %s595_s28 }
  0x55   : > { %p593_p3 = pneg %p592_p0  ;;  %p598_p2 = scmp.lt.s32.totalorder %s596_s30, %s590_s21 }
  0x57   : > { %p599_p6 = por %p598_p2, %p597_p10 }
  0x59   : > { %p600_p9 = pnand %p599_p6, %p593_p3 }
  0x5b   : > { %603 = shalt.err (!%p600_p9)
}
  0x5c   : > { %s604_s4 = scalar_lea.hbm %s902_s17, 32  ;;  %s608_s11 = scalar_lea.hbm %s1002_s3, 64 }
  0x5d   : > { %p605_p7 = scmp.ne.s32.totalorder %s902_s17, %s604_s4  ;;  %p609_p4 = scmp.lt.u32.totalorder %s902_s17, %s1002_s3 }
  0x5e   : > { %p610_p5 = scmp.lt.u32.totalorder %s608_s11, %s604_s4  ;;  %p612_p11 = scmp.lt.u32.totalorder %s604_s4, %s902_s17 }
  0x5f   : > { %p606_p13 = pnand %p605_p7, %p1013_p12 }
  0x60   : > { %p611_p8 = por %p610_p5, %p609_p4 }
  0x61   : > { %p607_p1 = pneg %p606_p13 }
  0x62   : > { %p613_p0 = por %p612_p11, %p611_p8 }
  0x64   : > { %p614_p3 = pnand %p613_p0, %p607_p1 }
  0x66   : > { %617 = shalt.err (!%p614_p3)
}
  0x67   : > { %475 = dma.vmem_to_hbm [thread:$0]  (%p1013_p12), %s887_s5, 32, %s902_s17, %s281_s19   ;;  %v237_v28 = vadd.f32 1e-10, %v236_v20  ;;  %v250_v29 = vadd.f32 %v249_v26, %v248_v21  ;;  %v253_v30 = vstv %s878_s16  ;;  %v256_v31 = vmul.f32 %v255_v23, %v865_v1 }
  0x68   : > { %542 = vtanh.f32 %v232_v24  ;;  %v254_v32 = vadd.f32 %v253_v30, %v252_v27  ;;  %v257_v33 = vstv %s881_s14  ;;  %s443_s5 = sshll.u32 %s857_s13, 3  ;;  %s470_s18 = sshll.u32 %s698_s25, 7 }
  0x69   : > { %v239_v34 = vadd.f32 %v238_v25, %v237_v28  ;;  %v258_v35 = vadd.f32 %v257_v33, %v256_v31  ;;  %v263_v36 = vmul.f32 %v250_v29, %v250_v29  ;;  %s188_s16 = scalar_lea.vmem [#allocation7], %s443_s5  ;;  %s946_s19 = scalar_lea.hbm %s1001_s2, %s470_s18 }
  0x6a   : > { %v265_v37 = vmul.f32 %v254_v32, %v254_v32  ;;  %s296_s14 = sshll.u32 %s188_s16, 4  ;;  %s276_s25 = scalar_lea.sflag [#allocation6], %s857_s13  ;;  %s941_s14 = int_to_ptr.vmem [resolvable:$true] %s296_s14 }
  0x6b   : > { %544 = vrsqrt.f32 %v239_v34  ;;  %v259_v38 = vmul.f32 0.5, %v258_v35  ;;  %v264_v39 = vadd.f32 1e-10, %v263_v36  ;;  %s618_s21 = scalar_lea.vmem %s941_s14, 128  ;;  %s711_s27 = smov [#allocation7]  }
  0x6c   : > { %p619_p10 = scmp.ne.s32.totalorder %s941_s14, %s618_s21  ;;  %s622_s28 = sshll.u32 %s711_s27, 4  ;;  %s623_s28 = int_to_ptr.vmem [resolvable:$false] %s622_s28 }
  0x6d   : > { %546 = vtanh.f32 %v259_v38  ;;  %v266_v40 = vadd.f32 %v265_v37, %v264_v39  ;;  %s624_s30 = scalar_lea.vmem %s623_s28, 256  ;;  %p625_p9 = scmp.lt.s32.totalorder %s941_s14, %s623_s28 }
  0x6e   : > { %p620_p2 = pnand %p619_p10, %p1013_p12  ;;  %p626_p7 = scmp.lt.s32.totalorder %s624_s30, %s618_s21 }
  0x6f   : > { %548 = vrsqrt.f32 %v266_v40 }
  0x70   : > { %p621_p6 = pneg %p620_p2  ;;  %p627_p13 = por %p626_p7, %p625_p9 }
  0x72   : > { %v543_v41 = vpop.eup %542  ;;  %p628_p1 = pnand %p627_p13, %p621_p6 }
  0x73   : > { %v234_v42 = vmul.f32 8.0, %v543_v41 }
  0x75   : > { %v545_v43 = vpop.eup %544  ;;  %v235_v44 = vadd.f32 8.0, %v234_v42 }
  0x77   : > { %v547_v45 = vpop.eup %546  ;;  %v241_v46 = vmul.f32 %v545_v43, %v235_v44 }
  0x78   : > { %v261_v47 = vmul.f32 8.0, %v547_v45 }
  0x79   : > { %v549_v48 = vpop.eup %548  ;;  %v242_v49 = vmul.f32 %v241_v46, %v889_v15  ;;  %v244_v50 = vmul.f32 %v241_v46, %v891_v17 }
  0x7a   : > { %v262_v51 = vadd.f32 8.0, %v261_v47 }
  0x7b   : > { %243 = vst.msk [vmem:[%s188_s16] sm:$0x3] %vm872_vm0, %v242_v49  ;;  %458 = vst.msk [vmem:[%s188_s16 + $0x2] sm:$0x3] %vm872_vm0, %v244_v50 }
  0x7c   : > { %v268_v52 = vmul.f32 %v549_v48, %v262_v51 }
  0x7e   : > { %v269_v53 = vmul.f32 %v268_v52, %v250_v29  ;;  %v272_v54 = vmul.f32 %v268_v52, %v254_v32 }
  0x80   : > { %459 = vst.msk [vmem:[%s188_s16 + $0x4] sm:$0x3] %vm872_vm0, %v269_v53  ;;  %460 = vst.msk [vmem:[%s188_s16 + $0x6] sm:$0x3] %vm872_vm0, %v272_v54 }
  0x81   : > { %631 = shalt.err (!%p628_p1)
}
  0x82   : > { %s632_s4 = scalar_lea.hbm %s946_s19, 128  ;;  %s636_s11 = scalar_lea.hbm %s1001_s2, 256 }
  0x83   : > { %p633_p4 = scmp.ne.s32.totalorder %s946_s19, %s632_s4  ;;  %p637_p11 = scmp.lt.u32.totalorder %s946_s19, %s1001_s2 }
  0x84   : > { %p638_p0 = scmp.lt.u32.totalorder %s636_s11, %s632_s4  ;;  %p640_p10 = scmp.lt.u32.totalorder %s632_s4, %s946_s19 }
  0x85   : > { %p634_p5 = pnand %p633_p4, %p1013_p12 }
  0x86   : > { %p639_p3 = por %p638_p0, %p637_p11 }
  0x87   : > { %p635_p8 = pneg %p634_p5 }
  0x88   : > { %p641_p2 = por %p640_p10, %p639_p3 }
  0x8a   : > { %p642_p6 = pnand %p641_p2, %p635_p8 }
  0x8c   : > { %645 = shalt.err (!%p642_p6)
}
  0x8d   : > { %s712_s5 = smov 32   ;;  %s713_s16 = smov 2  }
  0x8e   : > { %474 = dma.vmem_to_hbm [thread:$0]  (%p1013_p12), %s941_s14, 128, %s946_s19, %s276_s25, %s712_s5, %s712_s5, %s713_s16  }
  0x8f PF: > { %s327_s18 = sand.u32 1, %s686_s22   ;;  %p1014_p9 = scmp.ne.s32.totalorder %s1007_s9, 0 }
  0x90   : > { %p1015_p7 = scmp.ge.s32.totalorder %s706_s0, 2  ;;  %s328_s15 = scalar_lea.sflag [#allocation6], %s327_s18 }
  0x92   : > { %p483_p13 = pnand %p1015_p7, %p1014_p9 }
  0x94   : > { %677 = dma.done.wait (!%p483_p13), %s328_s15, 128  }
  0x95   : > { %679 = vsyncadd (!%p483_p13), %s328_s15, 4294967168  ;;  %s337_s17 = scalar_lea.sflag [#allocation9], %s327_s18 }
  0x96   : > { %681 = dma.done.wait (!%p483_p13), %s337_s17, 32  }
  0x97   : > { %683 = vsyncadd (!%p483_p13), %s337_s17, 4294967264  ;;  %s27_s0 = sadd.s32 1, %s706_s0   ;;  %s1016_s22 = smov %s690_s23 }
  0x98   : > { %p24_p1 = scmp.ge.s32.totalorder %s27_s0, 4   ;;  %s1017_s23 = smov %s694_s24 }
  0x99   : > { %s1018_s24 = smov %s802_s8  ;;  %s1019_s25 = smov %s702_s26 }
  0x9a   : > { %s1020_s26 = smov %s1022_s29  ;;  %26 = sbr.rel (!%p24_p1) target bundleno = 20 (0x14), region = 89 }
  0xa1   :  { %342 = vsyncpa [#allocation5], 1 }
  0xa2   :  { %344 = vsyncpa [#allocation5 + $0x1], 1 }
  0xa3   :  { %345 = vsyncpa [#allocation6], 1 }
  0xa4   :  { %347 = vsyncpa [#allocation6 + $0x1], 1 }
  0xa5   :  { %348 = vsyncpa [#allocation9], 1 }
  0xa6   :  { %350 = vsyncpa [#allocation9 + $0x1], 1 }

</bundles_post_ra>
